<compile_context>
chip_gen: v7x
topology: tpu7x:2x2x1
jax: 0.10.0
libtpu: 0.0.40
codegen_flags: <defaults>
</compile_context>

<pallas_src>
import functools

import jax
import jax.numpy as jnp
import numpy as np
from jax.experimental import pallas as pl
from jax.experimental.pallas import tpu as pltpu


EPS = 1e-5   # VITS modules.LayerNorm default
LANE = 128   # TPU lane width


def _round_up(n, m):
    return ((n + m - 1) // m) * m


def _layer_norm_padded(h, gamma, beta, f_real):
    """LayerNorm over the (possibly zero-padded) channel/lane dim of (M, Fp).

    Padded lanes of `h` carry zeros (weights / bias padded with zeros), so the
    mean is correct from a plain lane-sum divided by the real channel count;
    the variance additionally masks out the padded lanes.  Padded gamma/beta
    are zero so padded output lanes stay zero.
    """
    fp = h.shape[-1]
    inv_f = 1.0 / f_real
    m = jnp.sum(h, axis=-1, keepdims=True) * inv_f
    d = h - m
    sq = d * d
    if fp != f_real:
        col = jax.lax.broadcasted_iota(jnp.int32, (1, fp), 1)
        sq = jnp.where(col < f_real, sq, 0.0)
    v = jnp.sum(sq, axis=-1, keepdims=True) * inv_f
    return d * jax.lax.rsqrt(v + EPS) * gamma + beta


def duration_predictor_kernel(
    x_ref, mask3_ref, mask2_ref,
    w1_ref, b1_ref, g1_ref, be1_ref,
    w2_ref, b2_ref, g2_ref, be2_ref,
    wp_ref, bp_ref,
    out_ref,
    *, kernel_size, seq_len, batch_block, f_real, fuse1, fuse2,
):
    K = kernel_size
    p = K // 2
    T = seq_len
    Bb = batch_block

    x = x_ref[...].astype(jnp.float32)          # (Bb, T, Cin)
    mask3 = mask3_ref[...].astype(jnp.float32)  # (Bb, T, 1)

    def shifted_tap(hm, s):
        # shifted[:, t, :] = hm[:, t + s, :], zeros outside [0, T) (conv zero pad).
        if s == 0:
            return hm
        z = jnp.zeros((Bb, abs(s), hm.shape[-1]), hm.dtype)
        if s > 0:
            return jnp.concatenate([hm[:, s:, :], z], axis=1)
        return jnp.concatenate([z, hm[:, :T + s, :]], axis=1)

    def conv_relu_ln(hm_bf16, w_ref, b_ref, g_ref, be_ref, fused):
        """hm_bf16: (Bb, T, Cin) masked activations, already cast to bf16."""
        cin = hm_bf16.shape[-1]
        if fused:
            # im2col: lane-concat the K shifted taps -> ONE bf16 MXU matmul.
            # Used only when K*Cin is small (layer 1 with tiny input channels).
            taps = [shifted_tap(hm_bf16, k - p) for k in range(K)]
            slab = jnp.concatenate(taps, axis=-1)                  # (Bb, T, K*Cin)
            acc = jnp.dot(slab.reshape(Bb * T, K * cin), w_ref[...],
                          preferred_element_type=jnp.float32)
        else:
            # K accumulating dots: avoids materializing the K-times slab
            # (v7x's MRB accumulates the chained dots in place).
            acc = None
            for k in range(K):
                tap = shifted_tap(hm_bf16, k - p).reshape(Bb * T, cin)
                d = jnp.dot(tap, w_ref[k], preferred_element_type=jnp.float32)
                acc = d if acc is None else acc + d
        acc = acc + b_ref[...]                                     # bias once (f32)
        acc = jnp.maximum(acc, 0.0)                                # relu   (f32)
        acc = _layer_norm_padded(acc, g_ref[...], be_ref[...], f_real)
        return acc.reshape(Bb, T, acc.shape[-1])                   # (Bb, T, Fp) f32

    # ---- layer 1 (bf16 matmul operands, f32 accumulation / elementwise) ----
    hm1 = (x * mask3).astype(jnp.bfloat16)
    h = conv_relu_ln(hm1, w1_ref, b1_ref, g1_ref, be1_ref, fuse1)
    # TODO(synk): nn.Dropout is identity at inference; a training-mode version
    # would need pltpu.prng_seed/prng_random_bits and is intentionally omitted.

    fp = h.shape[-1]
    # Hoist the activation-width mask broadcast once (used by layer 2 and proj);
    # JAX does not CSE broadcast_in_dim.
    mask_f = jnp.broadcast_to(mask3, (Bb, T, fp))

    # ---- layer 2 ----
    hm2 = (h * mask_f).astype(jnp.bfloat16)
    h = conv_relu_ln(hm2, w2_ref, b2_ref, g2_ref, be2_ref, fuse2)

    # ---- proj (1x1 conv -> 1 channel) as a lane reduction; lane-dense output ----
    o = jnp.sum((h * mask_f) * wp_ref[...], axis=-1) + bp_ref[...]   # (Bb, T)
    mask2 = mask2_ref[0]                                             # (Bb, T), T on lanes
    out_ref[0] = (o * mask2).astype(out_ref.dtype)


def _two_tensorcore_chip():
    """True on chips with two TensorCores per chip (v7x); False on v5e/v6e."""
    try:
        kind = jax.devices()[0].device_kind.lower()
    except Exception:
        return False
    return ("v7" in kind) or ("7x" in kind)


def duration_predictor(x, x_mask, params, kernel_size, batch_block=None):
    """x: (B, T, Cin), x_mask: (B, T, 1)  ->  (B, T, 1)."""
    B, T, Cin = x.shape
    K = kernel_size
    F_real = params["w1"].shape[2]

    if batch_block is None:
        # Single-TC chips (v5e/v6e): one grid step with the whole batch folded
        # into the matmul M dim (grid is a serial loop there).  Two-TC chips
        # (v7x): split into 2 steps only if M per step stays >= 256.
        batch_block = B
        if _two_tensorcore_chip() and B % 2 == 0 and (B // 2) * T >= 256:
            batch_block = B // 2
    if B % batch_block != 0:   # fall back instead of asserting (e.g. odd batch)
        batch_block = B
    Bb = batch_block
    nb = B // Bb

    # Pad channel dims to the 128-lane width (dense vregs / full MXU columns /
    # unmasked stores).  Padded entries are zero; LN divides by the real F.
    Fp = _round_up(F_real, LANE)

    def pad_last(a, target):
        d = target - a.shape[-1]
        return a if d == 0 else jnp.pad(a, [(0, 0)] * (a.ndim - 1) + [(0, d)])

    # Per-layer conv path: fuse the K taps into one im2col matmul only while
    # the fused contraction dim stays small; otherwise K accumulating dots.
    fuse1 = (K * Cin) <= 256
    fuse2 = (K * Fp) <= 256

    # Conv weights, channels-last (K, Cin, Cout), matmul operands pre-cast bf16.
    w1 = pad_last(params["w1"], Fp).astype(jnp.bfloat16)               # (K, Cin, Fp)
    if fuse1:
        w1 = w1.reshape(K * Cin, Fp)
    w2 = pad_last(params["w2"], Fp)                                    # (K, F, Fp)
    w2 = jnp.pad(w2, ((0, 0), (0, Fp - F_real), (0, 0))).astype(jnp.bfloat16)  # (K, Fp, Fp)
    if fuse2:
        w2 = w2.reshape(K * Fp, Fp)

    b1 = pad_last(params["b1"], Fp)
    g1 = pad_last(params["g1"], Fp)
    be1 = pad_last(params["be1"], Fp)
    b2 = pad_last(params["b2"], Fp)
    g2 = pad_last(params["g2"], Fp)
    be2 = pad_last(params["be2"], Fp)
    wp = pad_last(params["wp"].reshape(1, F_real), Fp)                 # (1, Fp) f32
    bp = params["bp"].reshape(1, 1)

    # Lane-dense (T on lanes) copy of the mask for the final output masking.
    mask2 = x_mask[..., 0].reshape(nb, Bb, T)

    w1_shape, w2_shape = w1.shape, w2.shape

    grid_spec = pltpu.PrefetchScalarGridSpec(
        num_scalar_prefetch=0,
        grid=(nb,),
        in_specs=[
            pl.BlockSpec((Bb, T, Cin), lambda b: (b, 0, 0)),           # x
            pl.BlockSpec((Bb, T, 1), lambda b: (b, 0, 0)),             # mask (chan bcast)
            pl.BlockSpec((1, Bb, T), lambda b: (b, 0, 0)),             # mask (lane-dense)
            pl.BlockSpec(w1_shape, lambda b: (0,) * len(w1_shape)),    # w1 (bf16)
            pl.BlockSpec((1, Fp), lambda b: (0, 0)),                   # b1
            pl.BlockSpec((1, Fp), lambda b: (0, 0)),                   # gamma1
            pl.BlockSpec((1, Fp), lambda b: (0, 0)),                   # beta1
            pl.BlockSpec(w2_shape, lambda b: (0,) * len(w2_shape)),    # w2 (bf16)
            pl.BlockSpec((1, Fp), lambda b: (0, 0)),                   # b2
            pl.BlockSpec((1, Fp), lambda b: (0, 0)),                   # gamma2
            pl.BlockSpec((1, Fp), lambda b: (0, 0)),                   # beta2
            pl.BlockSpec((1, Fp), lambda b: (0, 0)),                   # proj weight row
            pl.BlockSpec((1, 1), lambda b: (0, 0)),                    # proj bias
        ],
        out_specs=pl.BlockSpec((1, Bb, T), lambda b: (b, 0, 0)),       # T on lanes
    )

    kernel = functools.partial(
        duration_predictor_kernel,
        kernel_size=K, seq_len=T, batch_block=Bb, f_real=F_real,
        fuse1=fuse1, fuse2=fuse2)

    # TODO(synk): for production-length sequences (T ~ 1000) add a T grid axis
    # with a K//2-frame halo and an explicit per-generation vmem_limit_bytes
    # budget (v7x has only 64 MiB VMEM); unnecessary at the shapes tested here.
    out = pl.pallas_call(
        kernel,
        out_shape=jax.ShapeDtypeStruct((nb, Bb, T), x.dtype),
        grid_spec=grid_spec,
        compiler_params=pltpu.CompilerParams(
            dimension_semantics=("parallel",)),
    )(x, x_mask, mask2,
      w1, b1, g1, be1,
      w2, b2, g2, be2,
      wp, bp)

    return out.reshape(B, T)[..., None]   # (B, T, 1) == PyTorch (B, 1, T) transposed


# ---------------- pure-JAX reference (same math, no Pallas) ----------------
def reference(x, x_mask, params, K, matmul_dtype=jnp.float32):
    p = K // 2
    T = x.shape[1]

    def conv(h, w, b):  # h: (B,T,Cin), w: (K,Cin,Cout), b: (1,Cout)
        hm = (h * x_mask).astype(matmul_dtype)
        hp = jnp.pad(hm, ((0, 0), (p, p), (0, 0)))
        wc = w.astype(matmul_dtype)
        acc = jnp.zeros(h.shape[:2] + (w.shape[2],), jnp.float32)
        for k in range(K):
            acc = acc + jnp.einsum("btc,cf->btf", hp[:, k:k + T, :], wc[k],
                                   preferred_element_type=jnp.float32)
        return acc + b

    def ln(h, g, be):
        m = jnp.mean(h, axis=-1, keepdims=True)
        v = jnp.mean(jnp.square(h - m), axis=-1, keepdims=True)
        return (h - m) * jax.lax.rsqrt(v + EPS) * g + be

    h = ln(jnp.maximum(conv(x, params["w1"], params["b1"]), 0.0),
           params["g1"], params["be1"])
    h = ln(jnp.maximum(conv(h, params["w2"], params["b2"]), 0.0),
           params["g2"], params["be2"])
    o = jnp.einsum("btf,fo->bto", h * x_mask, params["wp"]) + params["bp"]
    return o * x_mask


if __name__ == "__main__":
    # Module hyper-params (gin_channels=0, so no `cond` branch / g=None path).
    in_channels, filter_channels, kernel_size = 16, 32, 3
    B, T = 2, 16

    key = jax.random.PRNGKey(0)
    ks = jax.random.split(key, 8)

    params = {
        "w1": 0.1 * jax.random.normal(ks[0], (kernel_size, in_channels, filter_channels), jnp.float32),
        "b1": 0.1 * jax.random.normal(ks[1], (1, filter_channels), jnp.float32),
        "g1": jnp.ones((1, filter_channels), jnp.float32),
        "be1": jnp.zeros((1, filter_channels), jnp.float32),
        "w2": 0.1 * jax.random.normal(ks[2], (kernel_size, filter_channels, filter_channels), jnp.float32),
        "b2": 0.1 * jax.random.normal(ks[3], (1, filter_channels), jnp.float32),
        "g2": jnp.ones((1, filter_channels), jnp.float32),
        "be2": jnp.zeros((1, filter_channels), jnp.float32),
        "wp": 0.1 * jax.random.normal(ks[4], (filter_channels, 1), jnp.float32),
        "bp": 0.1 * jax.random.normal(ks[5], (1, 1), jnp.float32),
    }

    x = jax.random.normal(ks[6], (B, T, in_channels), jnp.float32)
    # Mask: first batch fully valid, second batch valid for first 10 frames.
    lengths = jnp.array([T, 10])
    x_mask = (jnp.arange(T)[None, :] < lengths[:, None]).astype(jnp.float32)[..., None]  # (B,T,1)

    out = duration_predictor(x, x_mask, params, kernel_size)
    out = jax.block_until_ready(out)

    # Tight check against a bf16-matmul-operand reference (same rounding as kernel).
    ref_bf16 = reference(x, x_mask, params, kernel_size, matmul_dtype=jnp.bfloat16)
    np.testing.assert_allclose(np.asarray(out), np.asarray(ref_bf16), atol=5e-3, rtol=5e-3)

    # Looser check against the full-f32 PyTorch-faithful reference (bf16 operand error).
    ref_f32 = reference(x, x_mask, params, kernel_size, matmul_dtype=jnp.float32)
    np.testing.assert_allclose(np.asarray(out), np.asarray(ref_f32), atol=3e-2, rtol=3e-2)

    print("KERNEL_OK")
</pallas_src>

<mosaic_0001>
module attributes {stable_mosaic.version = 11 : i64} {
  func.func @duration_predictor_kernel(%arg0: i32, %arg1: memref<2x16x16xf32, #tpu.memory_space<vmem>>, %arg2: memref<2x16x1xf32, #tpu.memory_space<vmem>>, %arg3: memref<1x2x16xf32, #tpu.memory_space<vmem>>, %arg4: memref<48x128xbf16, #tpu.memory_space<vmem>>, %arg5: memref<1x128xf32, #tpu.memory_space<vmem>>, %arg6: memref<1x128xf32, #tpu.memory_space<vmem>>, %arg7: memref<1x128xf32, #tpu.memory_space<vmem>>, %arg8: memref<3x128x128xbf16, #tpu.memory_space<vmem>>, %arg9: memref<1x128xf32, #tpu.memory_space<vmem>>, %arg10: memref<1x128xf32, #tpu.memory_space<vmem>>, %arg11: memref<1x128xf32, #tpu.memory_space<vmem>>, %arg12: memref<1x128xf32, #tpu.memory_space<vmem>>, %arg13: memref<1x1xf32, #tpu.memory_space<vmem>>, %arg14: memref<1x2x16xf32, #tpu.memory_space<vmem>>) attributes {dimension_semantics = [#tpu.dimension_semantics<parallel>], iteration_bounds = array<i64: 1>, scalar_prefetch = 0 : i64, scratch_operands = 0 : i64, tpu.core_type = #tpu.core_type<tc>, window_params = [{transform_indices = @transform_0, window_bounds = array<i64: 2, 16, 16>}, {transform_indices = @transform_1, window_bounds = array<i64: 2, 16, 1>}, {transform_indices = @transform_2, window_bounds = array<i64: 1, 2, 16>}, {pipeline_mode = #tpu.pipeline_mode<synchronous>, transform_indices = @transform_3, window_bounds = array<i64: 48, 128>}, {pipeline_mode = #tpu.pipeline_mode<synchronous>, transform_indices = @transform_4, window_bounds = array<i64: 1, 128>}, {pipeline_mode = #tpu.pipeline_mode<synchronous>, transform_indices = @transform_5, window_bounds = array<i64: 1, 128>}, {pipeline_mode = #tpu.pipeline_mode<synchronous>, transform_indices = @transform_6, window_bounds = array<i64: 1, 128>}, {pipeline_mode = #tpu.pipeline_mode<synchronous>, transform_indices = @transform_7, window_bounds = array<i64: 3, 128, 128>}, {pipeline_mode = #tpu.pipeline_mode<synchronous>, transform_indices = @transform_8, window_bounds = array<i64: 1, 128>}, {pipeline_mode = #tpu.pipeline_mode<synchronous>, transform_indices = @transform_9, window_bounds = array<i64: 1, 128>}, {pipeline_mode = #tpu.pipeline_mode<synchronous>, transform_indices = @transform_10, window_bounds = array<i64: 1, 128>}, {pipeline_mode = #tpu.pipeline_mode<synchronous>, transform_indices = @transform_11, window_bounds = array<i64: 1, 128>}, {pipeline_mode = #tpu.pipeline_mode<synchronous>, transform_indices = @transform_12, window_bounds = array<i64: 1, 1>}, {transform_indices = @transform_13, window_bounds = array<i64: 1, 2, 16>}]} {
    %c0 = arith.constant 0 : index
    %c0_0 = arith.constant 0 : index
    %c0_1 = arith.constant 0 : index
    %0 = vector.load %arg1[%c0, %c0_0, %c0_1] : memref<2x16x16xf32, #tpu.memory_space<vmem>>, vector<2x16x16xf32>
    %c0_2 = arith.constant 0 : index
    %c0_3 = arith.constant 0 : index
    %c0_4 = arith.constant 0 : index
    %1 = vector.load %arg2[%c0_2, %c0_3, %c0_4] : memref<2x16x1xf32, #tpu.memory_space<vmem>>, vector<2x16x1xf32>
    %2 = vector.broadcast %1 : vector<2x16x1xf32> to vector<2x16x16xf32>
    %3 = arith.mulf %0, %2 : vector<2x16x16xf32>
    %4 = arith.truncf %3 : vector<2x16x16xf32> to vector<2x16x16xbf16>
    %cst = arith.constant 0.000000e+00 : bf16
    %5 = vector.broadcast %cst : bf16 to vector<2x1x16xbf16>
    %6 = vector.extract_strided_slice %4 {offsets = [0, 0, 0], sizes = [2, 15, 16], strides = [1, 1, 1]} : vector<2x16x16xbf16> to vector<2x15x16xbf16>
    %7 = tpu.concatenate %5, %6 in 1 : vector<2x1x16xbf16>, vector<2x15x16xbf16> -> vector<2x16x16xbf16>
    %cst_5 = arith.constant 0.000000e+00 : bf16
    %8 = vector.broadcast %cst_5 : bf16 to vector<2x1x16xbf16>
    %9 = vector.extract_strided_slice %4 {offsets = [0, 1, 0], sizes = [2, 15, 16], strides = [1, 1, 1]} : vector<2x16x16xbf16> to vector<2x15x16xbf16>
    %10 = tpu.concatenate %9, %8 in 1 : vector<2x15x16xbf16>, vector<2x1x16xbf16> -> vector<2x16x16xbf16>
    %11 = tpu.concatenate %7, %4, %10 in 2 : vector<2x16x16xbf16>, vector<2x16x16xbf16>, vector<2x16x16xbf16> -> vector<2x16x48xbf16>
    %12 = vector.shape_cast %11 : vector<2x16x48xbf16> to vector<32x48xbf16>
    %c0_6 = arith.constant 0 : index
    %c0_7 = arith.constant 0 : index
    %13 = vector.load %arg4[%c0_6, %c0_7] : memref<48x128xbf16, #tpu.memory_space<vmem>>, vector<48x128xbf16>
    %cst_8 = arith.constant dense<0.000000e+00> : vector<32x128xf32>
    %14 = tpu.matmul %12, %13, %cst_8 {dimension_numbers = #tpu.dot_dimension_numbers<[1], [0], [0], [1], [0, 0, 1, 1], [], []>} : vector<32x48xbf16>, vector<48x128xbf16>, vector<32x128xf32> -> vector<32x128xf32>
    %c0_9 = arith.constant 0 : index
    %c0_10 = arith.constant 0 : index
    %15 = vector.load %arg5[%c0_9, %c0_10] : memref<1x128xf32, #tpu.memory_space<vmem>>, vector<1x128xf32>
    %16 = vector.broadcast %15 : vector<1x128xf32> to vector<32x128xf32>
    %17 = arith.addf %14, %16 : vector<32x128xf32>
    %cst_11 = arith.constant 0.000000e+00 : f32
    %18 = vector.broadcast %cst_11 : f32 to vector<32x128xf32>
    %19 = arith.maximumf %17, %18 : vector<32x128xf32>
    %c0_12 = arith.constant 0 : index
    %c0_13 = arith.constant 0 : index
    %20 = vector.load %arg6[%c0_12, %c0_13] : memref<1x128xf32, #tpu.memory_space<vmem>>, vector<1x128xf32>
    %c0_14 = arith.constant 0 : index
    %c0_15 = arith.constant 0 : index
    %21 = vector.load %arg7[%c0_14, %c0_15] : memref<1x128xf32, #tpu.memory_space<vmem>>, vector<1x128xf32>
    %cst_16 = arith.constant dense<0.000000e+00> : vector<32xf32>
    %22 = vector.multi_reduction <add>, %19, %cst_16 [1] : vector<32x128xf32> to vector<32xf32>
    %23 = vector.shape_cast %22 : vector<32xf32> to vector<32x1xf32>
    %cst_17 = arith.constant 3.125000e-02 : f32
    %24 = vector.broadcast %cst_17 : f32 to vector<32x1xf32>
    %25 = arith.mulf %23, %24 : vector<32x1xf32>
    %26 = vector.broadcast %25 : vector<32x1xf32> to vector<32x128xf32>
    %27 = arith.subf %19, %26 : vector<32x128xf32>
    %28 = arith.mulf %27, %27 : vector<32x128xf32>
    %29 = tpu.iota {dimensions = array<i32: 1>} : vector<1x128xi32>
    %c32_i32 = arith.constant 32 : i32
    %30 = vector.broadcast %c32_i32 : i32 to vector<1x128xi32>
    %31 = arith.cmpi slt, %29, %30 : vector<1x128xi32>
    %cst_18 = arith.constant 0.000000e+00 : f32
    %32 = vector.shape_cast %31 : vector<1x128xi1> to vector<1x128xi1>
    %33 = vector.broadcast %32 : vector<1x128xi1> to vector<32x128xi1>
    %34 = vector.broadcast %cst_18 : f32 to vector<32x128xf32>
    %35 = arith.select %33, %28, %34 : vector<32x128xi1>, vector<32x128xf32>
    %cst_19 = arith.constant dense<0.000000e+00> : vector<32xf32>
    %36 = vector.multi_reduction <add>, %35, %cst_19 [1] : vector<32x128xf32> to vector<32xf32>
    %37 = vector.shape_cast %36 : vector<32xf32> to vector<32x1xf32>
    %cst_20 = arith.constant 3.125000e-02 : f32
    %38 = vector.broadcast %cst_20 : f32 to vector<32x1xf32>
    %39 = arith.mulf %37, %38 : vector<32x1xf32>
    %cst_21 = arith.constant 9.99999974E-6 : f32
    %40 = vector.broadcast %cst_21 : f32 to vector<32x1xf32>
    %41 = arith.addf %39, %40 : vector<32x1xf32>
    %42 = math.rsqrt %41 : vector<32x1xf32>
    %43 = vector.broadcast %42 : vector<32x1xf32> to vector<32x128xf32>
    %44 = arith.mulf %27, %43 : vector<32x128xf32>
    %45 = vector.broadcast %20 : vector<1x128xf32> to vector<32x128xf32>
    %46 = arith.mulf %44, %45 : vector<32x128xf32>
    %47 = vector.broadcast %21 : vector<1x128xf32> to vector<32x128xf32>
    %48 = arith.addf %46, %47 : vector<32x128xf32>
    %49 = vector.shape_cast %48 : vector<32x128xf32> to vector<2x16x128xf32>
    %50 = vector.shape_cast %1 : vector<2x16x1xf32> to vector<2x16x1xf32>
    %51 = vector.broadcast %50 : vector<2x16x1xf32> to vector<2x16x128xf32>
    %52 = arith.mulf %49, %51 : vector<2x16x128xf32>
    %53 = arith.truncf %52 : vector<2x16x128xf32> to vector<2x16x128xbf16>
    %cst_22 = arith.constant 0.000000e+00 : bf16
    %54 = vector.broadcast %cst_22 : bf16 to vector<2x1x128xbf16>
    %55 = vector.extract_strided_slice %53 {offsets = [0, 0, 0], sizes = [2, 15, 128], strides = [1, 1, 1]} : vector<2x16x128xbf16> to vector<2x15x128xbf16>
    %56 = tpu.concatenate %54, %55 in 1 : vector<2x1x128xbf16>, vector<2x15x128xbf16> -> vector<2x16x128xbf16>
    %57 = vector.shape_cast %56 : vector<2x16x128xbf16> to vector<32x128xbf16>
    %c0_23 = arith.constant 0 : index
    %c0_24 = arith.constant 0 : index
    %c0_25 = arith.constant 0 : index
    %58 = vector.load %arg8[%c0_23, %c0_24, %c0_25] : memref<3x128x128xbf16, #tpu.memory_space<vmem>>, vector<1x128x128xbf16>
    %59 = vector.shape_cast %58 : vector<1x128x128xbf16> to vector<128x128xbf16>
    %cst_26 = arith.constant dense<0.000000e+00> : vector<32x128xf32>
    %60 = tpu.matmul %57, %59, %cst_26 {dimension_numbers = #tpu.dot_dimension_numbers<[1], [0], [0], [1], [0, 0, 1, 1], [], []>} : vector<32x128xbf16>, vector<128x128xbf16>, vector<32x128xf32> -> vector<32x128xf32>
    %61 = vector.shape_cast %53 : vector<2x16x128xbf16> to vector<32x128xbf16>
    %c1 = arith.constant 1 : index
    %c0_27 = arith.constant 0 : index
    %c0_28 = arith.constant 0 : index
    %62 = vector.load %arg8[%c1, %c0_27, %c0_28] : memref<3x128x128xbf16, #tpu.memory_space<vmem>>, vector<1x128x128xbf16>
    %63 = vector.shape_cast %62 : vector<1x128x128xbf16> to vector<128x128xbf16>
    %cst_29 = arith.constant dense<0.000000e+00> : vector<32x128xf32>
    %64 = tpu.matmul %61, %63, %cst_29 {dimension_numbers = #tpu.dot_dimension_numbers<[1], [0], [0], [1], [0, 0, 1, 1], [], []>} : vector<32x128xbf16>, vector<128x128xbf16>, vector<32x128xf32> -> vector<32x128xf32>
    %65 = arith.addf %60, %64 : vector<32x128xf32>
    %cst_30 = arith.constant 0.000000e+00 : bf16
    %66 = vector.broadcast %cst_30 : bf16 to vector<2x1x128xbf16>
    %67 = vector.extract_strided_slice %53 {offsets = [0, 1, 0], sizes = [2, 15, 128], strides = [1, 1, 1]} : vector<2x16x128xbf16> to vector<2x15x128xbf16>
    %68 = tpu.concatenate %67, %66 in 1 : vector<2x15x128xbf16>, vector<2x1x128xbf16> -> vector<2x16x128xbf16>
    %69 = vector.shape_cast %68 : vector<2x16x128xbf16> to vector<32x128xbf16>
    %c2 = arith.constant 2 : index
    %c0_31 = arith.constant 0 : index
    %c0_32 = arith.constant 0 : index
    %70 = vector.load %arg8[%c2, %c0_31, %c0_32] : memref<3x128x128xbf16, #tpu.memory_space<vmem>>, vector<1x128x128xbf16>
    %71 = vector.shape_cast %70 : vector<1x128x128xbf16> to vector<128x128xbf16>
    %cst_33 = arith.constant dense<0.000000e+00> : vector<32x128xf32>
    %72 = tpu.matmul %69, %71, %cst_33 {dimension_numbers = #tpu.dot_dimension_numbers<[1], [0], [0], [1], [0, 0, 1, 1], [], []>} : vector<32x128xbf16>, vector<128x128xbf16>, vector<32x128xf32> -> vector<32x128xf32>
    %73 = arith.addf %65, %72 : vector<32x128xf32>
    %c0_34 = arith.constant 0 : index
    %c0_35 = arith.constant 0 : index
    %74 = vector.load %arg9[%c0_34, %c0_35] : memref<1x128xf32, #tpu.memory_space<vmem>>, vector<1x128xf32>
    %75 = vector.broadcast %74 : vector<1x128xf32> to vector<32x128xf32>
    %76 = arith.addf %73, %75 : vector<32x128xf32>
    %cst_36 = arith.constant 0.000000e+00 : f32
    %77 = vector.broadcast %cst_36 : f32 to vector<32x128xf32>
    %78 = arith.maximumf %76, %77 : vector<32x128xf32>
    %c0_37 = arith.constant 0 : index
    %c0_38 = arith.constant 0 : index
    %79 = vector.load %arg10[%c0_37, %c0_38] : memref<1x128xf32, #tpu.memory_space<vmem>>, vector<1x128xf32>
    %c0_39 = arith.constant 0 : index
    %c0_40 = arith.constant 0 : index
    %80 = vector.load %arg11[%c0_39, %c0_40] : memref<1x128xf32, #tpu.memory_space<vmem>>, vector<1x128xf32>
    %cst_41 = arith.constant dense<0.000000e+00> : vector<32xf32>
    %81 = vector.multi_reduction <add>, %78, %cst_41 [1] : vector<32x128xf32> to vector<32xf32>
    %82 = vector.shape_cast %81 : vector<32xf32> to vector<32x1xf32>
    %cst_42 = arith.constant 3.125000e-02 : f32
    %83 = vector.broadcast %cst_42 : f32 to vector<32x1xf32>
    %84 = arith.mulf %82, %83 : vector<32x1xf32>
    %85 = vector.broadcast %84 : vector<32x1xf32> to vector<32x128xf32>
    %86 = arith.subf %78, %85 : vector<32x128xf32>
    %87 = arith.mulf %86, %86 : vector<32x128xf32>
    %88 = tpu.iota {dimensions = array<i32: 1>} : vector<1x128xi32>
    %c32_i32_43 = arith.constant 32 : i32
    %89 = vector.broadcast %c32_i32_43 : i32 to vector<1x128xi32>
    %90 = arith.cmpi slt, %88, %89 : vector<1x128xi32>
    %cst_44 = arith.constant 0.000000e+00 : f32
    %91 = vector.shape_cast %90 : vector<1x128xi1> to vector<1x128xi1>
    %92 = vector.broadcast %91 : vector<1x128xi1> to vector<32x128xi1>
    %93 = vector.broadcast %cst_44 : f32 to vector<32x128xf32>
    %94 = arith.select %92, %87, %93 : vector<32x128xi1>, vector<32x128xf32>
    %cst_45 = arith.constant dense<0.000000e+00> : vector<32xf32>
    %95 = vector.multi_reduction <add>, %94, %cst_45 [1] : vector<32x128xf32> to vector<32xf32>
    %96 = vector.shape_cast %95 : vector<32xf32> to vector<32x1xf32>
    %cst_46 = arith.constant 3.125000e-02 : f32
    %97 = vector.broadcast %cst_46 : f32 to vector<32x1xf32>
    %98 = arith.mulf %96, %97 : vector<32x1xf32>
    %cst_47 = arith.constant 9.99999974E-6 : f32
    %99 = vector.broadcast %cst_47 : f32 to vector<32x1xf32>
    %100 = arith.addf %98, %99 : vector<32x1xf32>
    %101 = math.rsqrt %100 : vector<32x1xf32>
    %102 = vector.broadcast %101 : vector<32x1xf32> to vector<32x128xf32>
    %103 = arith.mulf %86, %102 : vector<32x128xf32>
    %104 = vector.broadcast %79 : vector<1x128xf32> to vector<32x128xf32>
    %105 = arith.mulf %103, %104 : vector<32x128xf32>
    %106 = vector.broadcast %80 : vector<1x128xf32> to vector<32x128xf32>
    %107 = arith.addf %105, %106 : vector<32x128xf32>
    %108 = vector.shape_cast %107 : vector<32x128xf32> to vector<2x16x128xf32>
    %109 = arith.mulf %108, %51 : vector<2x16x128xf32>
    %c0_48 = arith.constant 0 : index
    %c0_49 = arith.constant 0 : index
    %110 = vector.load %arg12[%c0_48, %c0_49] : memref<1x128xf32, #tpu.memory_space<vmem>>, vector<1x128xf32>
    %111 = vector.shape_cast %110 : vector<1x128xf32> to vector<1x1x128xf32>
    %112 = vector.broadcast %111 : vector<1x1x128xf32> to vector<2x16x128xf32>
    %113 = arith.mulf %109, %112 : vector<2x16x128xf32>
    %cst_50 = arith.constant dense<0.000000e+00> : vector<2x16xf32>
    %114 = vector.multi_reduction <add>, %113, %cst_50 [2] : vector<2x16x128xf32> to vector<2x16xf32>
    %c0_51 = arith.constant 0 : index
    %c0_52 = arith.constant 0 : index
    %115 = vector.load %arg13[%c0_51, %c0_52] : memref<1x1xf32, #tpu.memory_space<vmem>>, vector<1x1xf32>
    %116 = vector.broadcast %115 : vector<1x1xf32> to vector<2x16xf32>
    %117 = arith.addf %114, %116 : vector<2x16xf32>
    %c0_53 = arith.constant 0 : index
    %c0_54 = arith.constant 0 : index
    %c0_55 = arith.constant 0 : index
    %118 = vector.load %arg3[%c0_53, %c0_54, %c0_55] : memref<1x2x16xf32, #tpu.memory_space<vmem>>, vector<1x2x16xf32>
    %119 = vector.shape_cast %118 : vector<1x2x16xf32> to vector<2x16xf32>
    %120 = arith.mulf %117, %119 : vector<2x16xf32>
    %c0_56 = arith.constant 0 : index
    %c0_57 = arith.constant 0 : index
    %c0_58 = arith.constant 0 : index
    %121 = vector.load %arg14[%c0_56, %c0_57, %c0_58] : memref<1x2x16xf32, #tpu.memory_space<vmem>>, vector<1x2x16xf32>
    %122 = vector.shape_cast %121 : vector<1x2x16xf32> to vector<2x16xf32>
    %123 = vector.shape_cast %120 : vector<2x16xf32> to vector<1x2x16xf32>
    tpu.vector_store %arg14[%c0_56, %c0_57, %c0_58], %123 {strides = array<i32>} : memref<1x2x16xf32, #tpu.memory_space<vmem>>, vector<1x2x16xf32>,
    return
  }
  func.func @transform_0(%arg0: i32) -> (i32, i32, i32) {
    %c0_i32 = arith.constant 0 : i32
    %c0_i32_0 = arith.constant 0 : i32
    %c0_i32_1 = arith.constant 0 : i32
    return %arg0, %c0_i32, %c0_i32_0 : i32, i32, i32
  }
  func.func @transform_1(%arg0: i32) -> (i32, i32, i32) {
    %c0_i32 = arith.constant 0 : i32
    %c0_i32_0 = arith.constant 0 : i32
    %c0_i32_1 = arith.constant 0 : i32
    return %arg0, %c0_i32, %c0_i32_0 : i32, i32, i32
  }
  func.func @transform_2(%arg0: i32) -> (i32, i32, i32) {
    %c0_i32 = arith.constant 0 : i32
    %c0_i32_0 = arith.constant 0 : i32
    %c0_i32_1 = arith.constant 0 : i32
    return %arg0, %c0_i32, %c0_i32_0 : i32, i32, i32
  }
  func.func @transform_3(%arg0: i32) -> (i32, i32) {
    %c0_i32 = arith.constant 0 : i32
    %c0_i32_0 = arith.constant 0 : i32
    %c0_i32_1 = arith.constant 0 : i32
    return %c0_i32, %c0_i32_0 : i32, i32
  }
  func.func @transform_4(%arg0: i32) -> (i32, i32) {
    %c0_i32 = arith.constant 0 : i32
    %c0_i32_0 = arith.constant 0 : i32
    %c0_i32_1 = arith.constant 0 : i32
    return %c0_i32, %c0_i32_0 : i32, i32
  }
  func.func @transform_5(%arg0: i32) -> (i32, i32) {
    %c0_i32 = arith.constant 0 : i32
    %c0_i32_0 = arith.constant 0 : i32
    %c0_i32_1 = arith.constant 0 : i32
    return %c0_i32, %c0_i32_0 : i32, i32
  }
  func.func @transform_6(%arg0: i32) -> (i32, i32) {
    %c0_i32 = arith.constant 0 : i32
    %c0_i32_0 = arith.constant 0 : i32
    %c0_i32_1 = arith.constant 0 : i32
    return %c0_i32, %c0_i32_0 : i32, i32
  }
  func.func @transform_7(%arg0: i32) -> (i32, i32, i32) {
    %c0_i32 = arith.constant 0 : i32
    %c0_i32_0 = arith.constant 0 : i32
    %c0_i32_1 = arith.constant 0 : i32
    %c0_i32_2 = arith.constant 0 : i32
    return %c0_i32, %c0_i32_0, %c0_i32_1 : i32, i32, i32
  }
  func.func @transform_8(%arg0: i32) -> (i32, i32) {
    %c0_i32 = arith.constant 0 : i32
    %c0_i32_0 = arith.constant 0 : i32
    %c0_i32_1 = arith.constant 0 : i32
    return %c0_i32, %c0_i32_0 : i32, i32
  }
  func.func @transform_9(%arg0: i32) -> (i32, i32) {
    %c0_i32 = arith.constant 0 : i32
    %c0_i32_0 = arith.constant 0 : i32
    %c0_i32_1 = arith.constant 0 : i32
    return %c0_i32, %c0_i32_0 : i32, i32
  }
  func.func @transform_10(%arg0: i32) -> (i32, i32) {
    %c0_i32 = arith.constant 0 : i32
    %c0_i32_0 = arith.constant 0 : i32
    %c0_i32_1 = arith.constant 0 : i32
    return %c0_i32, %c0_i32_0 : i32, i32
  }
  func.func @transform_11(%arg0: i32) -> (i32, i32) {
    %c0_i32 = arith.constant 0 : i32
    %c0_i32_0 = arith.constant 0 : i32
    %c0_i32_1 = arith.constant 0 : i32
    return %c0_i32, %c0_i32_0 : i32, i32
  }
  func.func @transform_12(%arg0: i32) -> (i32, i32) {
    %c0_i32 = arith.constant 0 : i32
    %c0_i32_0 = arith.constant 0 : i32
    %c0_i32_1 = arith.constant 0 : i32
    return %c0_i32, %c0_i32_0 : i32, i32
  }
  func.func @transform_13(%arg0: i32) -> (i32, i32, i32) {
    %c0_i32 = arith.constant 0 : i32
    %c0_i32_0 = arith.constant 0 : i32
    %c0_i32_1 = arith.constant 0 : i32
    return %arg0, %c0_i32, %c0_i32_0 : i32, i32, i32
  }
}

</mosaic_0001>

<bundles_post_ra>
// kernel: tpu_custom_call.1
= control target key start
LH: loop header
LB: loop body
LE: loop exit
PB: predicated region body
PF: predicated region fallthrough
CT: control target
= control target key end

     0   :  { %s1451_s0 = inlined_call_operand.vmem [shape: f32[2,16,16], index: 0, kind: input, shape index: {}]   ;;  %s1452_s1 = inlined_call_operand.vmem [shape: f32[2,16,1], index: 1, kind: input, shape index: {}]   ;;  %s1453_s2 = inlined_call_operand.vmem [shape: f32[1,2,16], index: 2, kind: input, shape index: {}]   ;;  %s1454_s3 = inlined_call_operand.hbm [shape: bf16[48,128], index: 3, kind: input, shape index: {}]   ;;  %s1455_s4 = inlined_call_operand.vmem [shape: f32[1,128], index: 4, kind: input, shape index: {}]   ;;  %s1456_s5 = inlined_call_operand.vmem [shape: f32[1,128], index: 5, kind: input, shape index: {}]   ;;  %s1457_s6 = inlined_call_operand.vmem [shape: f32[1,128], index: 6, kind: input, shape index: {}]   ;;  %s1458_s7 = inlined_call_operand.hbm [shape: bf16[3,128,128], index: 7, kind: input, shape index: {}]   ;;  %s1459_s8 = inlined_call_operand.vmem [shape: f32[1,128], index: 8, kind: input, shape index: {}]   ;;  %s1460_s9 = inlined_call_operand.vmem [shape: f32[1,128], index: 9, kind: input, shape index: {}]   ;;  %s1461_s10 = inlined_call_operand.vmem [shape: f32[1,128], index: 10, kind: input, shape index: {}]   ;;  %s1462_s11 = inlined_call_operand.vmem [shape: f32[1,128], index: 11, kind: input, shape index: {}]   ;;  %s1463_s12 = inlined_call_operand.<no memory space> [shape: f32[1,1], index: 12, kind: input, shape index: {}]   ;;  %s1464_s13 = inlined_call_operand.hbm [shape: f32[1,2,16], index: 13, kind: output, shape index: {}]  }
   0x1   :  { %v18_v0 = vstv %s1463_s12 }
   0x2   :  { %19 = vst [vmem:[#allocation2] sm:$0x1] %v18_v0 }
   0x3   :  { %20 = vsyncpa [#allocation4], 0 }
   0x4   :  { %21 = vsyncpa [#allocation7], 0 }
   0x5   :  { %22 = vsyncpa [#allocation5], 0  ;;  %s1193_s27 = smov [#allocation3]   ;;  %s1121_s14 = scalar_lea.hbm %s1454_s3, 384 }
   0x6   :  { %s34_s28 = sshll.u32 %s1193_s27, 4  ;;  %p1122_p0 = scmp.ne.s32.totalorder %s1454_s3, %s1121_s14  ;;  %s35_s28 = int_to_ptr.vmem [resolvable:$true] %s34_s28 }
   0x7   :  { %p1125_p1 = scmp.lt.u32.totalorder %s1121_s14, %s1454_s3 }
   0x9   :  { %p1127_p2 = pnand %p1125_p1, %p1122_p0 }
   0xb   :  { %1130 = shalt.err (!%p1127_p2)
}
   0xc   :  { %s1131_s12 = scalar_lea.vmem %s35_s28, 384  ;;  %p1136_p4 = scmp.lt.s32.totalorder %s35_s28, %s35_s28 }
   0xd   :  { %p1132_p3 = scmp.ne.s32.totalorder %s35_s28, %s1131_s12  ;;  %p1137_p5 = scmp.lt.s32.totalorder %s1131_s12, %s1131_s12 }
   0xf   :  { %p1138_p6 = por %p1137_p5, %p1136_p4 }
  0x11   :  { %p1139_p7 = pnand %p1138_p6, %p1132_p3 }
  0x13   :  { %1142 = shalt.err (!%p1139_p7)
}
  0x14   :  { %s1194_s19 = smov 64   ;;  %s1195_s20 = smov 4  }
  0x15   :  { %40 = dma.hbm_to_vmem [thread:$0]  %s1454_s3, 384, %s35_s28, [#allocation4], %s1194_s19, %s1194_s19, %s1195_s20  }
  0x16   :  { %s1196_s23 = smov [#allocation6]   ;;  %s1143_s27 = scalar_lea.hbm %s1458_s7, 3072 }
  0x17   :  { %s52_s24 = sshll.u32 %s1196_s23, 4  ;;  %p1144_p8 = scmp.ne.s32.totalorder %s1458_s7, %s1143_s27  ;;  %s53_s24 = int_to_ptr.vmem [resolvable:$true] %s52_s24 }
  0x18   :  { %p1147_p9 = scmp.lt.u32.totalorder %s1143_s27, %s1458_s7 }
  0x1a   :  { %p1149_p10 = pnand %p1147_p9, %p1144_p8 }
  0x1c   :  { %1152 = shalt.err (!%p1149_p10)
}
  0x1d   :  { %s1153_s16 = scalar_lea.vmem %s53_s24, 3072  ;;  %p1158_p12 = scmp.lt.s32.totalorder %s53_s24, %s53_s24 }
  0x1e   :  { %p1154_p11 = scmp.ne.s32.totalorder %s53_s24, %s1153_s16  ;;  %p1159_p13 = scmp.lt.s32.totalorder %s1153_s16, %s1153_s16 }
  0x20   :  { %p1160_p0 = por %p1159_p13, %p1158_p12 }
  0x22   :  { %p1161_p1 = pnand %p1160_p0, %p1154_p11 }
  0x24   :  { %1164 = shalt.err (!%p1161_p1)
}
  0x25   :  { %58 = dma.hbm_to_vmem [thread:$0]  %s1458_s7, 3072, %s53_s24, [#allocation7], %s1194_s19, %s1194_s19, %s1195_s20  }
  0x26   :  { %1187 = dma.done.wait [#allocation4], 384  }
  0x27   :  { %1188 = vsyncadd [#allocation4], 4294966912 }
  0x28   :  { %1189 = dma.done.wait [#allocation7], 3072  }
  0x29   :  { %1190 = vsyncadd [#allocation7], 4294964224  ;;  %v1197_v1 = vmov 0   ;;  %v82_v2 = vld [vmem:[%s1452_s1 + $0x10] sm:$0xff]  ;;  %v80_v3 = vld [vmem:[%s1452_s1] sm:$0xff]  ;;  %vm137_vm0 = vcmask 1047552   ;;  %v277_v62 = vlaneseq }
  0x2a   :  { %1077 = vset.pattern.permute.xlu1 %v1197_v1  ;;  %1076 = vset.pattern.permute.xlu0 %v1197_v1  ;;  %v83_v4 = vld [vmem:[%s1452_s1 + $0x18] sm:$0xff]  ;;  %v81_v5 = vld [vmem:[%s1452_s1 + $0x8] sm:$0xff]  ;;  %v78_v11 = vld [vmem:[%s1451_s0 + $0x10] sm:$0xff]  ;;  %vm138_vm1 = vsmask.f32 7424  ;;  %s1198_s14 = smov 16  }
  0x2b   :  { %96 = vperm.xlu1 %1077, %v82_v2   ;;  %86 = vperm.xlu0 %1076, %v80_v3   ;;  %v1078_v6 = vld [vmem:[#allocation3] sm:$0xff]   ;;  %v1079_v7 = vld [vmem:[#allocation3 + $0x8] sm:$0xff]   ;;  %v1080_v8 = vld [vmem:[#allocation3 + $0x10] sm:$0xff]   ;;  %vm126_vm3 = vcmask 1040384   ;;  %vm127_vm4 = vsmask.f32 256 }
  0x2c   :  { %990 = vmatprep.subr.bf16.mxu0 %v1078_v6  ;;  %v76_v12 = vld [vmem:[%s1451_s0] sm:$0xff]  ;;  %v79_v13 = vld [vmem:[%s1451_s0 + $0x18] sm:$0xff]  ;;  %v77_v14 = vld [vmem:[%s1451_s0 + $0x8] sm:$0xff]  ;;  %s1199_s0 = smov 32   ;;  %vm154_vm6 = vcmask 130048   ;;  %vm161_vm7 = vcmask 261120  }
  0x2d   :  { %991 = vmatpush3.bf16.msra.mxu0 %v1078_v6  ;;  %vm1334_vm2 = vmand %vm137_vm0, %vm138_vm1  ;;  %vm197_vm8 = vcmask 392192   ;;  %v918_v49 = vld [vmem:[%s1455_s4] ss:$0 sm:$0xff]  ;;  %v1354_v0 = vand.u32 127, %v277_v62  ;;  %v1103_v38 = vld [vmem:[#allocation6 + $0xb0] sm:$0xff]   ;;  %vm886_vm10 = vcmask 130112  }
  0x2e   :  { %992 = vmatprep.subr.bf16.mxu0 %v1079_v7  ;;  %vm1342_vm5 = vmand %vm126_vm3, %vm127_vm4  ;;  %vm897_vm11 = vcmask 1041409   ;;  %vm900_vm12 = vcmask 123904  }
  0x2f   :  { %101 = vperm.xlu1 %1077, %v83_v4   ;;  %91 = vperm.xlu0 %1076, %v81_v5   ;;  %vm279_vm9 = vcmp.lt.s32.totalorder %v1354_v0, 32 }
  0x31   :  { %993 = vmatpush3.bf16.msra.mxu0 %v1079_v7 }
  0x32   :  { %994 = vmatprep.subr.bf16.mxu0 %v1080_v8 }
  0x35   :  { %995 = vmatpush3.bf16.msra.mxu0 %v1080_v8 }
  0xaa   :  { %v1310_v9 = vpop.permute.xlu1 %96  ;;  %v1312_v10 = vpop.permute.xlu0 %86 }
  0xab   :  { %v106_v17 = vmul.f32 %v1310_v9, %v78_v11  ;;  %v104_v18 = vmul.f32 %v1312_v10, %v76_v12 }
  0xae   :  { %v1326_v15 = vpop.permute.xlu1 %101  ;;  %v1328_v16 = vpop.permute.xlu0 %91 }
  0xaf   :  { %v107_v19 = vmul.f32 %v1326_v15, %v79_v13  ;;  %v105_v20 = vmul.f32 %v1328_v16, %v77_v14 }
  0xb1   :  { %v109_v21 = vpack.c.bf16 %v107_v19, %v106_v17  ;;  %v108_v22 = vpack.c.bf16 %v105_v20, %v104_v18 }
  0xb3   :  { %146 = vrot.lane.b32.xlu1 %v109_v21, %s1198_s14  ;;  %144 = vrot.lane.b32.xlu0 %v108_v22, %s1198_s14  ;;  %v118_v23 = vshrl.u32 %v109_v21, 16  ;;  %v121_v24 = vshll.u32 %v109_v21, 16  ;;  %v111_v25 = vshrl.u32 %v108_v22, 16  ;;  %v114_v26 = vshll.u32 %v108_v22, 16 }
  0xb5   :  { %v133_v27 = vrot.slane %v121_v24, 1  ;;  %v120_v28 = vrot.slane %v118_v23, 7  ;;  %v131_v29 = vrot.slane %v114_v26, 1  ;;  %v113_v30 = vrot.slane %v111_v25, 7 }
  0xb7   :  { %v134_v32 = vor.u32 %v133_v27, %v118_v23  ;;  %v132_v33 = vor.u32 %v131_v29, %v111_v25  ;;  %v123_v34 = vor.u32 %v121_v24, %v120_v28  ;;  %v116_v35 = vor.u32 %v114_v26, %v113_v30  ;;  %v1081_v24 = vld [vmem:[#allocation6 + $0x40] sm:$0xff]   ;;  %v1082_v25 = vld [vmem:[#allocation6 + $0x48] sm:$0xff]   ;;  %v1084_v27 = vld [vmem:[#allocation6 + $0x50] sm:$0xff]  }
  0xb8   :  { %1000 = vmatprep.subr.bf16.mxu0 %v1081_v24  ;;  %v1083_v26 = vld [vmem:[#allocation6] sm:$0xff]   ;;  %v1085_v28 = vld [vmem:[#allocation6 + $0x8] sm:$0xff]   ;;  %v1086_v29 = vld [vmem:[#allocation6 + $0x58] sm:$0xff]  }
  0xb9   :  { %v141_v36 = vsel %vm1334_vm2, %v134_v32, 0  ;;  %v140_v37 = vsel %vm1334_vm2, %v132_v33, 0  ;;  %v130_v41 = vsel %vm1342_vm5, 0, %v123_v34  ;;  %v129_v42 = vsel %vm1342_vm5, 0, %v116_v35  ;;  %1020 = vmatprep.subr.bf16.mxu1 %v1083_v26  ;;  %v1087_v30 = vld [vmem:[#allocation6 + $0x10] sm:$0xff]   ;;  %v1088_v32 = vld [vmem:[#allocation6 + $0x60] sm:$0xff]  }
  0xba   :  { %152 = vrot.lane.b32.xlu1 %v141_v36, %s1199_s0  ;;  %150 = vrot.lane.b32.xlu0 %v140_v37, %s1199_s0  ;;  %v1089_v33 = vld [vmem:[#allocation6 + $0x18] sm:$0xff]   ;;  %v1090_v34 = vld [vmem:[#allocation6 + $0x68] sm:$0xff]   ;;  %v1091_v35 = vld [vmem:[#allocation6 + $0x20] sm:$0xff]  }
  0xbb   :  { %1021 = vmatpush3.bf16.msra.mxu1 %v1083_v26  ;;  %v1092_v36 = vld [vmem:[#allocation6 + $0x70] sm:$0xff]   ;;  %v1093_v37 = vld [vmem:[#allocation6 + $0x28] sm:$0xff]  }
  0xbc   :  { %1022 = vmatprep.subr.bf16.mxu1 %v1085_v28 }
  0xbf   :  { %1023 = vmatpush3.bf16.msra.mxu1 %v1085_v28 }
  0xc0   :  { %1024 = vmatprep.subr.bf16.mxu1 %v1087_v30 }
  0xc3   :  { %1025 = vmatpush3.bf16.msra.mxu1 %v1087_v30 }
  0xc4   :  { %1026 = vmatprep.subr.bf16.mxu1 %v1089_v33 }
  0xc7   :  { %1027 = vmatpush3.bf16.msra.mxu1 %v1089_v33  ;;  %v1098_v33 = vld [vmem:[#allocation6 + $0x88] sm:$0xff]  }
  0xc8   :  { %1028 = vmatprep.subr.bf16.mxu1 %v1091_v35 }
  0xcb   :  { %1029 = vmatpush3.bf16.msra.mxu1 %v1091_v35 }
  0xcc   :  { %1030 = vmatprep.subr.bf16.mxu1 %v1093_v37 }
  0xcf   :  { %1031 = vmatpush3.bf16.msra.mxu1 %v1093_v37  ;;  %v1100_v37 = vld [vmem:[#allocation6 + $0x98] sm:$0xff]  }
 0x125   :  { %v147_v39 = vpop.permute.xlu1 %146  ;;  %v145_v40 = vpop.permute.xlu0 %144 }
 0x126   :  { %v160_v43 = vsel %vm154_vm6, %v130_v41, %v147_v39  ;;  %v157_v44 = vsel %vm154_vm6, %v129_v42, %v145_v40  ;;  %v1094_v39 = vld [vmem:[#allocation6 + $0x78] sm:$0xff]   ;;  %v1095_v40 = vld [vmem:[#allocation6 + $0x30] sm:$0xff]   ;;  %v1097_v42 = vld [vmem:[#allocation6 + $0x80] sm:$0xff]  }
 0x127   :  { %1032 = vmatprep.subr.bf16.mxu1 %v1095_v40  ;;  %v1096_v41 = vld [vmem:[#allocation6 + $0x38] sm:$0xff]  }
 0x128   :  { %1033 = vmatpush3.bf16.msra.mxu1 %v1095_v40  ;;  %v1102_v40 = vld [vmem:[#allocation6 + $0xa8] sm:$0xff]  }
 0x129   :  { %1034 = vmatprep.subr.bf16.mxu1 %v1096_v41 }
 0x12c   :  { %v153_v45 = vpop.permute.xlu1 %152  ;;  %v151_v46 = vpop.permute.xlu0 %150  ;;  %1035 = vmatpush3.bf16.msra.mxu1 %v1096_v41  ;;  %v1104_v41 = vld [vmem:[#allocation6 + $0xb8] sm:$0xff]  }
 0x12d   :  { %v165_v47 = vsel %vm161_vm7, %v160_v43, %v153_v45  ;;  %v163_v48 = vsel %vm161_vm7, %v157_v44, %v151_v46  ;;  %1040 = vmatprep.subr.bf16.mxu1 %v1097_v42 }
 0x12e   :  { %996 = vmatprep.mubr.msk.bf16.mxu0 %vm197_vm8, %v163_v48 }
 0x12f   :  { %997 = vmatmul.mubr.msk.bf16.vlgmr.msra.gmra.mrb[0].mxu0 %vm197_vm8, %v165_v47 }
 0x130   :  { %1001 = vmatpush3.bf16.msra.mxu0 %v1081_v24 }
 0x131   :  { %1002 = vmatprep.subr.bf16.mxu0 %v1082_v25 }
 0x134   :  { %1003 = vmatpush3.bf16.msra.mxu0 %v1082_v25 }
 0x135   :  { %1004 = vmatprep.subr.bf16.mxu0 %v1084_v27 }
 0x138   :  { %1005 = vmatpush3.bf16.msra.mxu0 %v1084_v27 }
 0x139   :  { %1006 = vmatprep.subr.bf16.mxu0 %v1086_v29 }
 0x13c   :  { %1007 = vmatpush3.bf16.msra.mxu0 %v1086_v29 }
 0x13d   :  { %1008 = vmatprep.subr.bf16.mxu0 %v1088_v32 }
 0x140   :  { %1009 = vmatpush3.bf16.msra.mxu0 %v1088_v32 }
 0x141   :  { %1010 = vmatprep.subr.bf16.mxu0 %v1090_v34 }
 0x144   :  { %1011 = vmatpush3.bf16.msra.mxu0 %v1090_v34 }
 0x145   :  { %1012 = vmatprep.subr.bf16.mxu0 %v1092_v36 }
 0x148   :  { %1013 = vmatpush3.bf16.msra.mxu0 %v1092_v36  ;;  %v1099_v36 = vld [vmem:[#allocation6 + $0x90] sm:$0xff]  }
 0x149   :  { %1014 = vmatprep.subr.bf16.mxu0 %v1094_v39 }
 0x14c   :  { %1015 = vmatpush3.bf16.msra.mxu0 %v1094_v39  ;;  %v1101_v39 = vld [vmem:[#allocation6 + $0xa0] sm:$0xff]  }
 0x202   :  { %v998_v50 = vpop.f32.mrb[0].mxu0 }
 0x203   :  { %v236_v51 = vpop.f32.mrb[1].mxu0  ;;  %v245_v55 = vadd.f32 %v998_v50, %v918_v49 }
 0x204   :  { %v237_v52 = vadd.f32 %v918_v49, %v236_v51  ;;  %v999_v53 = vpop.f32.mrb[2].mxu0 }
 0x205   :  { %v239_v54 = vpop.f32.mrb[3].mxu0  ;;  %v253_v59 = vmax.f32 %v245_v55, 0.0  ;;  %v248_v60 = vadd.f32 %v999_v53, %v918_v49 }
 0x206   :  { %v251_v56 = vmax.f32 %v237_v52, 0.0  ;;  %v240_v57 = vadd.f32 %v918_v49, %v239_v54 }
 0x207   :  { %v254_v61 = vmax.f32 %v248_v60, 0.0 }
 0x208   :  { %v252_v58 = vmax.f32 %v240_v57, 0.0  ;;  %257 = vadd.xlane.f32.xlu0 %v251_v56 }
 0x20a   :  { %259 = vadd.xlane.f32.xlu1 %v252_v58 }
 0x20c   :  { %261 = vadd.xlane.f32.xlu0 %v253_v59 }
 0x210   :  { %263 = vadd.xlane.f32.xlu0 %v254_v61 }
 0x295   :  { %v258_v63 = vpop.xlane.xlu0 %257 }
 0x296   :  { %v265_v1 = vmul.f32 0.03125, %v258_v63 }
 0x297   :  { %v260_v2 = vpop.xlane.xlu1 %259 }
 0x298   :  { %v1356_v3 = vsub.f32 %v251_v56, %v265_v1  ;;  %v266_v4 = vmul.f32 0.03125, %v260_v2  ;;  %v924_v56 = vld [vmem:[%s1456_s5] ss:$0 sm:$0xff] }
 0x299   :  { %v262_v5 = vpop.xlane.xlu0 %261 }
 0x29a   :  { %v1359_v6 = vsub.f32 %v252_v58, %v266_v4  ;;  %v267_v7 = vmul.f32 0.03125, %v262_v5  ;;  %v273_v8 = vmul.f32 %v1356_v3, %v1356_v3 }
 0x29c   :  { %v1363_v11 = vsub.f32 %v253_v59, %v267_v7  ;;  %v282_v12 = vsel %vm279_vm9, %v273_v8, 0.0  ;;  %v274_v13 = vmul.f32 %v1359_v6, %v1359_v6  ;;  %v925_v59 = vld [vmem:[%s1457_s6] ss:$0 sm:$0xff] }
 0x29d   :  { %286 = vadd.xlane.f32.xlu1 %v282_v12  ;;  %v264_v14 = vpop.xlane.xlu0 %263 }
 0x29e   :  { %v268_v17 = vmul.f32 0.03125, %v264_v14  ;;  %v283_v18 = vsel %vm279_vm9, %v274_v13, 0.0  ;;  %v275_v19 = vmul.f32 %v1363_v11, %v1363_v11 }
 0x29f   :  { %288 = vadd.xlane.f32.xlu0 %v283_v18 }
 0x2a0   :  { %v1373_v20 = vsub.f32 %v254_v61, %v268_v17  ;;  %v284_v21 = vsel %vm279_vm9, %v275_v19, 0.0 }
 0x2a1   :  { %290 = vadd.xlane.f32.xlu1 %v284_v21 }
 0x2a2   :  { %v276_v22 = vmul.f32 %v1373_v20, %v1373_v20 }
 0x2a4   :  { %v285_v23 = vsel %vm279_vm9, %v276_v22, 0.0 }
 0x2a5   :  { %292 = vadd.xlane.f32.xlu0 %v285_v23 }
 0x32a   :  { %v287_v43 = vpop.xlane.xlu1 %286 }
 0x32b   :  { %v294_v44 = vmul.f32 0.03125, %v287_v43 }
 0x32c   :  { %v289_v45 = vpop.xlane.xlu0 %288 }
 0x32d   :  { %v298_v46 = vadd.f32 1e-05, %v294_v44  ;;  %v295_v47 = vmul.f32 0.03125, %v289_v45 }
 0x32e   :  { %v291_v48 = vpop.xlane.xlu1 %290 }
 0x32f   :  { %1105 = vrsqrt.f32 %v298_v46  ;;  %v299_v49 = vadd.f32 1e-05, %v295_v47  ;;  %v296_v50 = vmul.f32 0.03125, %v291_v48 }
 0x331   :  { %1107 = vrsqrt.f32 %v299_v49  ;;  %v300_v51 = vadd.f32 1e-05, %v296_v50 }
 0x332   :  { %v293_v52 = vpop.xlane.xlu0 %292 }
 0x333   :  { %1109 = vrsqrt.f32 %v300_v51  ;;  %v297_v53 = vmul.f32 0.03125, %v293_v52  ;;  %v950_v52 = vld [vmem:[%s1459_s8] ss:$0 sm:$0xff] }
 0x335   :  { %v301_v54 = vadd.f32 1e-05, %v297_v53 }
 0x337   :  { %1111 = vrsqrt.f32 %v301_v54 }
 0x339   :  { %v1106_v55 = vpop.eup %1105 }
 0x33a   :  { %v306_v57 = vmul.f32 %v1106_v55, %v1356_v3 }
 0x33b   :  { %v1108_v58 = vpop.eup %1107 }
 0x33c   :  { %v307_v60 = vmul.f32 %v1108_v58, %v1359_v6  ;;  %v316_v61 = vmul.f32 %v924_v56, %v306_v57 }
 0x33d   :  { %v1110_v63 = vpop.eup %1109 }
 0x33e   :  { %v308_v1 = vmul.f32 %v1110_v63, %v1363_v11  ;;  %v317_v2 = vmul.f32 %v924_v56, %v307_v60  ;;  %v326_v4 = vadd.f32 %v925_v59, %v316_v61 }
 0x340   :  { %v327_v5 = vadd.f32 %v925_v59, %v317_v2  ;;  %v318_v7 = vmul.f32 %v924_v56, %v308_v1  ;;  %v330_v3 = vmul.f32 %v326_v4, %v1312_v10 }
 0x341   :  { %v1112_v8 = vpop.eup %1111 }
 0x342   :  { %v309_v12 = vmul.f32 %v1112_v8, %v1373_v20  ;;  %v331_v13 = vmul.f32 %v327_v5, %v1328_v16  ;;  %v328_v18 = vadd.f32 %v925_v59, %v318_v7 }
 0x344   :  { %v334_v14 = vpack.c.bf16 %v331_v13, %v330_v3  ;;  %v319_v17 = vmul.f32 %v924_v56, %v309_v12  ;;  %v332_v11 = vmul.f32 %v328_v18, %v1310_v9 }
 0x346   :  { %1016 = vmatprep.mubr.bf16.mxu0 %v334_v14  ;;  %v329_v6 = vadd.f32 %v925_v59, %v319_v17  ;;  %v337_v19 = vshrl.u32 %v334_v14, 16  ;;  %v340_v21 = vshll.u32 %v334_v14, 16 }
 0x348   :  { %v333_v22 = vmul.f32 %v329_v6, %v1326_v15  ;;  %v339_v23 = vrot.slane %v337_v19, 7  ;;  %v581_v26 = vrot.slane %v340_v21, 1 }
 0x34a   :  { %v335_v24 = vpack.c.bf16 %v333_v22, %v332_v11  ;;  %v342_v25 = vor.u32 %v340_v21, %v339_v23  ;;  %v582_v30 = vor.u32 %v581_v26, %v337_v19 }
 0x34c   :  { %1017 = vmatmul.mubr.bf16.vlgmr.msra.gmra.mrb[4].mxu0 %v335_v24  ;;  %v352_v20 = vsel %vm1342_vm5, 0, %v342_v25  ;;  %v344_v27 = vshrl.u32 %v335_v24, 16  ;;  %v347_v29 = vshll.u32 %v335_v24, 16  ;;  %v587_v35 = vsel %vm1334_vm2, %v582_v30, 0  ;;  %v829_v30 = vld [vmem:[%s1453_s2] sm:$0x3] }
 0x34d   :  { %1036 = vmatprep.mubr.bf16.mxu1 %v352_v20 }
 0x34e   :  { %v346_v28 = vrot.slane %v344_v27, 7  ;;  %v583_v43 = vrot.slane %v347_v29, 1 }
 0x350   :  { %v349_v32 = vor.u32 %v347_v29, %v346_v28  ;;  %v954_v29 = vld [vmem:[#allocation2] ss:$0 sm:$0xff] }
 0x352   :  { %v353_v34 = vsel %vm1342_vm5, 0, %v349_v32 }
 0x353   :  { %1037 = vmatmul.mubr.bf16.vlgmr.msra.gmra.mrb[0].mxu1 %v353_v34 }
 0x354   :  { %1041 = vmatpush3.bf16.msra.mxu1 %v1097_v42  ;;  %1056 = vmatprep.mubr.bf16.mxu1 %v587_v35  ;;  %v584_v42 = vor.u32 %v583_v43, %v344_v27  ;;  %v1415_v27 = vshrl.u32 %v277_v62, 7 }
 0x355   :  { %1042 = vmatprep.subr.bf16.mxu1 %v1098_v33 }
 0x356   :  { %v588_v44 = vsel %vm1334_vm2, %v584_v42, 0  ;;  %v833_v28 = vsub.s32 0, %v1415_v27 }
 0x358   :  { %1043 = vmatpush3.bf16.msra.mxu1 %v1098_v33  ;;  %v834_v32 = vrot.slane %v829_v30, %v833_v28  ;;  %v881_v28 = vadd.s32 4294967288, %v1354_v0 }
 0x359   :  { %1044 = vmatprep.subr.bf16.mxu1 %v1099_v36 }
 0x35c   :  { %1045 = vmatpush3.bf16.msra.mxu1 %v1099_v36 }
 0x35d   :  { %1046 = vmatprep.subr.bf16.mxu1 %v1100_v37 }
 0x360   :  { %1047 = vmatpush3.bf16.msra.mxu1 %v1100_v37 }
 0x361   :  { %1048 = vmatprep.subr.bf16.mxu1 %v1101_v39 }
 0x364   :  { %1049 = vmatpush3.bf16.msra.mxu1 %v1101_v39 }
 0x365   :  { %1050 = vmatprep.subr.bf16.mxu1 %v1102_v40 }
 0x368   :  { %1051 = vmatpush3.bf16.msra.mxu1 %v1102_v40 }
 0x369   :  { %1052 = vmatprep.subr.bf16.mxu1 %v1103_v38 }
 0x36c   :  { %1053 = vmatpush3.bf16.msra.mxu1 %v1103_v38 }
 0x36d   :  { %1054 = vmatprep.subr.bf16.mxu1 %v1104_v41 }
 0x370   :  { %1055 = vmatpush3.bf16.msra.mxu1 %v1104_v41 }
 0x373   :  { %1057 = vmatmul.mubr.bf16.vlgmr.msra.gmra.mrb[0].mxu1 %v588_v44 }
 0x41f   :  { %v1018_v45 = vpop.f32.mrb[4].mxu0 }
 0x420   :  { %v469_v46 = vpop.f32.mrb[5].mxu0 }
 0x421   :  { %v1019_v47 = vpop.f32.mrb[6].mxu0 }
 0x422   :  { %v472_v48 = vpop.f32.mrb[7].mxu0 }
 0x446   :  { %v1058_v49 = vpop.f32.mrb[0].mxu1 }
 0x447   :  { %v1060_v50 = vadd.f32 %v1058_v49, %v1018_v45  ;;  %v688_v51 = vpop.f32.mrb[1].mxu1 }
 0x448   :  { %v1061_v53 = vadd.f32 %v688_v51, %v469_v46  ;;  %v1059_v54 = vpop.f32.mrb[2].mxu1 }
 0x449   :  { %v1062_v55 = vadd.f32 %v1059_v54, %v1019_v47  ;;  %v691_v56 = vpop.f32.mrb[3].mxu1  ;;  %v716_v60 = vadd.f32 %v1060_v50, %v950_v52  ;;  %v951_v47 = vld [vmem:[%s1460_s9] ss:$0 sm:$0xff] }
 0x44a   :  { %v1063_v57 = vadd.f32 %v691_v56, %v472_v48  ;;  %v714_v58 = vadd.f32 %v1061_v53, %v950_v52  ;;  %v952_v53 = vld [vmem:[%s1461_s10] ss:$0 sm:$0xff]  ;;  %s1200_s10 = smov [#allocation8]  }
 0x44b   :  { %v717_v63 = vadd.f32 %v1062_v55, %v950_v52  ;;  %v720_v1 = vmax.f32 %v716_v60, 0.0 }
 0x44c   :  { %v718_v31 = vmax.f32 %v714_v58, 0.0  ;;  %v715_v59 = vadd.f32 %v1063_v57, %v950_v52 }
 0x44d   :  { %v721_v2 = vmax.f32 %v717_v63, 0.0  ;;  %v953_v63 = vld [vmem:[%s1462_s11] ss:$0 sm:$0xff]  ;;  %s908_s11 = sshll.u32 %s1200_s10, 4  ;;  %s909_s11 = int_to_ptr.vmem [resolvable:$true] %s908_s11 }
 0x44e   :  { %724 = vadd.xlane.f32.xlu1 %v718_v31  ;;  %v719_v61 = vmax.f32 %v715_v59, 0.0  ;;  %s1165_s7 = scalar_lea.vmem %s909_s11, 32  ;;  %p1170_p3 = scmp.lt.s32.totalorder %s909_s11, %s909_s11 }
 0x44f   :  { %p1166_p2 = scmp.ne.s32.totalorder %s909_s11, %s1165_s7  ;;  %p1171_p4 = scmp.lt.s32.totalorder %s1165_s7, %s1165_s7 }
 0x450   :  { %726 = vadd.xlane.f32.xlu0 %v719_v61 }
 0x451   :  { %p1172_p5 = por %p1171_p4, %p1170_p3 }
 0x452   :  { %728 = vadd.xlane.f32.xlu1 %v720_v1 }
 0x453   :  { %p1173_p6 = pnand %p1172_p5, %p1166_p2 }
 0x454   :  { %730 = vadd.xlane.f32.xlu0 %v721_v2 }
 0x4db   :  { %v725_v4 = vpop.xlane.xlu1 %724 }
 0x4dc   :  { %v732_v5 = vmul.f32 0.03125, %v725_v4 }
 0x4dd   :  { %v727_v7 = vpop.xlane.xlu0 %726 }
 0x4de   :  { %v736_v8 = vsub.f32 %v718_v31, %v732_v5  ;;  %v733_v12 = vmul.f32 0.03125, %v727_v7 }
 0x4df   :  { %v729_v3 = vpop.xlane.xlu1 %728 }
 0x4e0   :  { %v737_v13 = vsub.f32 %v719_v61, %v733_v12  ;;  %v734_v14 = vmul.f32 0.03125, %v729_v3  ;;  %v740_v17 = vmul.f32 %v736_v8, %v736_v8 }
 0x4e1   :  { %v731_v18 = vpop.xlane.xlu0 %730 }
 0x4e2   :  { %v738_v6 = vsub.f32 %v720_v1, %v734_v14  ;;  %v735_v19 = vmul.f32 0.03125, %v731_v18  ;;  %v744_v21 = vsel %vm279_vm9, %v740_v17, 0.0  ;;  %v741_v11 = vmul.f32 %v737_v13, %v737_v13 }
 0x4e3   :  { %748 = vadd.xlane.f32.xlu1 %v744_v21 }
 0x4e4   :  { %v739_v22 = vsub.f32 %v721_v2, %v735_v19  ;;  %v745_v23 = vsel %vm279_vm9, %v741_v11, 0.0  ;;  %v742_v24 = vmul.f32 %v738_v6, %v738_v6 }
 0x4e5   :  { %750 = vadd.xlane.f32.xlu0 %v745_v23 }
 0x4e6   :  { %v746_v25 = vsel %vm279_vm9, %v742_v24, 0.0  ;;  %v743_v26 = vmul.f32 %v739_v22, %v739_v22 }
 0x4e7   :  { %752 = vadd.xlane.f32.xlu1 %v746_v25 }
 0x4e8   :  { %v747_v20 = vsel %vm279_vm9, %v743_v26, 0.0 }
 0x4e9   :  { %754 = vadd.xlane.f32.xlu0 %v747_v20 }
 0x4f8   :  { %822 = vperm.xlu1 %1077, %v954_v29  }
 0x4fc   :  { %840 = vbcast.lane.b32.xlu1 %v834_v32, 264 }
 0x4ff   :  { %836 = vbcast.lane.b32.xlu0 %v834_v32, 256 }
 0x570   :  { %v749_v33 = vpop.xlane.xlu1 %748 }
 0x571   :  { %v756_v34 = vmul.f32 0.03125, %v749_v33  ;;  %v879_v33 = vsub.s32 %v1354_v0, %v1415_v27 }
 0x572   :  { %v751_v35 = vpop.xlane.xlu0 %750 }
 0x573   :  { %v760_v36 = vadd.f32 1e-05, %v756_v34  ;;  %v757_v37 = vmul.f32 0.03125, %v751_v35 }
 0x574   :  { %v753_v39 = vpop.xlane.xlu1 %752 }
 0x575   :  { %1113 = vrsqrt.f32 %v760_v36  ;;  %v761_v62 = vadd.f32 1e-05, %v757_v37  ;;  %v758_v40 = vmul.f32 0.03125, %v753_v39 }
 0x576   :  { %v755_v38 = vpop.xlane.xlu0 %754 }
 0x577   :  { %1115 = vrsqrt.f32 %v761_v62  ;;  %v762_v41 = vadd.f32 1e-05, %v758_v40  ;;  %v759_v43 = vmul.f32 0.03125, %v755_v38 }
 0x579   :  { %1117 = vrsqrt.f32 %v762_v41  ;;  %v763_v42 = vadd.f32 1e-05, %v759_v43 }
 0x57a   :  { %v837_v17 = vpop.permute.xlu0 %836 }
 0x57b   :  { %1119 = vrsqrt.f32 %v763_v42 }
 0x57f   :  { %v1114_v44 = vpop.eup %1113 }
 0x580   :  { %v768_v45 = vmul.f32 %v1114_v44, %v736_v8 }
 0x581   :  { %v1116_v46 = vpop.eup %1115 }
 0x582   :  { %v769_v48 = vmul.f32 %v1116_v46, %v737_v13  ;;  %v778_v51 = vmul.f32 %v951_v47, %v768_v45  ;;  %v823_v13 = vpop.permute.xlu1 %822 }
 0x583   :  { %v1118_v49 = vpop.eup %1117 }
 0x584   :  { %v770_v50 = vmul.f32 %v1118_v49, %v738_v6  ;;  %v779_v56 = vmul.f32 %v951_v47, %v769_v48  ;;  %v788_v31 = vadd.f32 %v952_v53, %v778_v51 }
 0x585   :  { %v1120_v52 = vpop.eup %1119 }
 0x586   :  { %v780_v54 = vmul.f32 %v951_v47, %v770_v50  ;;  %v771_v55 = vmul.f32 %v1120_v52, %v739_v22  ;;  %v789_v61 = vadd.f32 %v952_v53, %v779_v56  ;;  %v792_v4 = vmul.f32 %v788_v31, %v1312_v10  ;;  %v841_v14 = vpop.permute.xlu1 %840 }
 0x588   :  { %v790_v57 = vadd.f32 %v952_v53, %v780_v54  ;;  %v781_v58 = vmul.f32 %v951_v47, %v771_v55  ;;  %v793_v7 = vmul.f32 %v789_v61, %v1328_v16  ;;  %v803_v8 = vmul.f32 %v953_v63, %v792_v4 }
 0x58a   :  { %v794_v59 = vmul.f32 %v790_v57, %v1310_v9  ;;  %v791_v60 = vadd.f32 %v952_v53, %v781_v58  ;;  %v804_v12 = vmul.f32 %v953_v63, %v793_v7  ;;  %v844_v9 = vsub.s32 1, %v1415_v27 }
 0x58c   :  { %v805_v1 = vmul.f32 %v953_v63, %v794_v59  ;;  %v795_v2 = vmul.f32 %v791_v60, %v1326_v15  ;;  %v845_v3 = vrot.slane %v829_v30, %v844_v9  ;;  %v884_v30 = vsub.s32 %v881_v28, %v1415_v27 }
 0x58e   :  { %811 = vadd.xlane.f32.xlu1 %v805_v1  ;;  %v806_v5 = vmul.f32 %v953_v63, %v795_v2 }
 0x590   :  { %813 = vadd.xlane.f32.xlu0 %v806_v5 }
 0x592   :  { %807 = vadd.xlane.f32.xlu1 %v803_v8 }
 0x594   :  { %809 = vadd.xlane.f32.xlu0 %v804_v12 }
 0x5a3   :  { %847 = vbcast.lane.b32.xlu1 %v845_v3, 256 }
 0x5aa   :  { %851 = vbcast.lane.b32.xlu0 %v845_v3, 264 }
 0x61b   :  { %v812_v15 = vpop.xlane.xlu1 %811 }
 0x61c   :  { %v827_v22 = vadd.f32 %v823_v13, %v812_v15 }
 0x61d   :  { %v814_v18 = vpop.xlane.xlu0 %813 }
 0x61e   :  { %v828_v25 = vadd.f32 %v823_v13, %v814_v18 }
 0x61f   :  { %v808_v10 = vpop.xlane.xlu1 %807 }
 0x620   :  { %v825_v6 = vadd.f32 %v823_v13, %v808_v10 }
 0x621   :  { %v810_v19 = vpop.xlane.xlu0 %809 }
 0x622   :  { %v857_v21 = vmul.f32 %v837_v17, %v825_v6  ;;  %v826_v16 = vadd.f32 %v823_v13, %v810_v19 }
 0x623   :  { %v848_v11 = vpop.permute.xlu1 %847 }
 0x624   :  { %v858_v23 = vmul.f32 %v841_v14, %v826_v16  ;;  %866 = vperm.xlu1 %1077, %v857_v21   ;;  %v859_v26 = vmul.f32 %v848_v11, %v827_v22 }
 0x625   :  { %v852_v24 = vpop.permute.xlu0 %851 }
 0x626   :  { %869 = vperm.xlu0 %1076, %v858_v23   ;;  %v860_v20 = vmul.f32 %v852_v24, %v828_v25 }
 0x628   :  { %872 = vperm.xlu1 %1077, %v859_v26  }
 0x62a   :  { %875 = vperm.xlu0 %1076, %v860_v20  }
 0x6a3   :  { %v867_v29 = vpop.permute.xlu1 %866 }
 0x6a4   :  { %v880_v37 = vrot.slane %v867_v29, %v879_v33 }
 0x6a5   :  { %v870_v32 = vpop.permute.xlu0 %869 }
 0x6a6   :  { %v885_v35 = vrot.slane %v870_v32, %v884_v30 }
 0x6a7   :  { %v873_v34 = vpop.permute.xlu1 %872 }
 0x6a8   :  { %v891_v39 = vrot.slane %v873_v34, %v879_v33  ;;  %v887_v40 = vsel %vm886_vm10, %v885_v35, %v880_v37 }
 0x6a9   :  { %v876_v36 = vpop.permute.xlu0 %875 }
 0x6aa   :  { %v895_v62 = vrot.slane %v876_v36, %v884_v30 }
 0x6ac   :  { %v896_v38 = vsel %vm886_vm10, %v895_v62, %v891_v39 }
 0x6ad   :  { %v898_v41 = vsel %vm897_vm11, %v896_v38, %v887_v40 }
 0x6ae   :  { %901 = vst.msk [vmem:[#allocation8] sm:$0x3] %vm900_vm12, %v898_v41 }
 0x6af   :  { %1176 = shalt.err (!%p1173_p6)
}
 0x6b0   :  { %s1177_s24 = scalar_lea.hbm %s1464_s13, 32 }
 0x6b1   :  { %p1178_p7 = scmp.ne.s32.totalorder %s1464_s13, %s1177_s24  ;;  %p1181_p8 = scmp.lt.u32.totalorder %s1177_s24, %s1464_s13 }
 0x6b3   :  { %p1183_p9 = pnand %p1181_p8, %p1178_p7 }
 0x6b5   :  { %1186 = shalt.err (!%p1183_p9)
}
 0x6b6   :  { %911 = dma.vmem_to_hbm [thread:$0]  %s909_s11, 32, %s1464_s13, [#allocation5]  }
 0x6b7   :  { %1191 = dma.done.wait [#allocation5], 32  }
 0x6b8   :  { %1192 = vsyncadd [#allocation5], 4294967264 }
 0x6b9   :  { %915 = vsyncpa [#allocation4], 1 }
 0x6ba   :  { %916 = vsyncpa [#allocation7], 1 }
 0x6bb   :  { %917 = vsyncpa [#allocation5], 1 }

</bundles_post_ra>
